<compile_context>
chip_gen: v6e
topology: v6e:2x2x1
jax: 0.10.0
libtpu: 0.0.40
codegen_flags: <defaults>
</compile_context>

<pallas_src>
import functools

import jax
import jax.numpy as jnp
from jax.experimental import pallas as pl
from jax.experimental.pallas import tpu as pltpu


# Tile caps: 512 x 2048 f32 = 4 MiB per input block. 3 inputs x 2 buffers
# (+ output double-buffer on the 'none' path) stays <= ~32 MiB live, under the
# explicit 48 MiB VMEM limit (headroom under v7x's 64 MiB physical VMEM).
_TB_CAP = 512
_TT_CAP = 2048
_VMEM_LIMIT_BYTES = 48 * 1024 * 1024


def _nll(mu, sig, tgt, approx):
    """Elementwise negative Gaussian log-likelihood, computed in f32."""
    mu = mu.astype(jnp.float32)
    sig = sig.astype(jnp.float32)
    tgt = tgt.astype(jnp.float32)
    d = tgt - mu
    var = sig * sig
    # 0.5 * d^2 / var + log(sigma); EUP reciprocal + log, VPU mul/add.
    return 0.5 * (d * d) * pl.reciprocal(var, approx=approx) + jnp.log(sig)


def _gll_mean_kernel(mu_ref, sig_ref, tgt_ref, out_ref, acc_ref, *, inv_b, approx):
    """grid = (T_tiles [parallel], B_tiles [arbitrary accumulation axis])."""
    bi = pl.program_id(1)

    @pl.when(bi == 0)
    def _init():
        acc_ref[...] = jnp.zeros_like(acc_ref)

    nll = _nll(mu_ref[...], sig_ref[...], tgt_ref[...], approx)    # [tb, tt] f32

    # Collapse tb sublanes down to acc_ref's row count with pure, sublane-aligned
    # VPU adds; the cross-sublane XLU reduce is deferred to the finalize below.
    rows = acc_ref.shape[0]
    tb = nll.shape[0]
    partial = nll[0:rows, :]
    for k in range(1, tb // rows):
        partial = partial + nll[k * rows:(k + 1) * rows, :]
    acc_ref[...] += partial

    @pl.when(bi == pl.num_programs(1) - 1)
    def _finalize():
        total = jnp.sum(acc_ref[...], axis=0, keepdims=True)       # [1, tt] f32
        out_ref[...] = (total * inv_b).astype(out_ref.dtype)


def _gll_none_kernel(mu_ref, sig_ref, tgt_ref, out_ref, *, approx):
    """grid = (B_tiles [parallel], T_tiles [parallel]); pure elementwise."""
    out_ref[...] = _nll(mu_ref[...], sig_ref[...], tgt_ref[...],
                        approx).astype(out_ref.dtype)


def _dividing_block(n, cap, quantum):
    """Largest multiple of `quantum` <= cap that divides n, or None."""
    k = (cap // quantum) * quantum
    while k >= quantum:
        if n % k == 0:
            return k
        k -= quantum
    return None


def _resolve_block(n, cap, quantum, user):
    """Pick a block size; never falls back to an unbounded full dimension."""
    if user is not None:
        return max(1, min(int(user), n))
    if n <= cap:
        return n                      # full (small) dim is always a legal block
    blk = _dividing_block(n, cap, quantum)
    if blk is not None:
        return blk
    return (cap // quantum) * quantum  # non-dividing -> padded tail tile


def _pad2d(x, rows, cols, value):
    b, t = x.shape
    if rows == b and cols == t:
        return x
    return jnp.pad(x, ((0, rows - b), (0, cols - t)), constant_values=value)


def gaussian_log_likelihood_planar(mu, sig, tgt, reduction="mean", *,
                                   block_b=None, block_t=None,
                                   approx_reciprocal=False):
    """Planar fast path: mu, sig, tgt are all [B, T] (no interleaved param axis).

    Returns [T, 1] for reduction='mean', else [B, T, 1] -- matching the PyTorch
    GaussianLogLikelihood.forward semantics.
    """
    B, T = mu.shape
    dtype = mu.dtype

    tb = _resolve_block(B, _TB_CAP, 8, block_b)
    tt = _resolve_block(T, _TT_CAP, 128, block_t)

    # v7x has two TensorCores; in the 'mean' path only the T axis is parallel,
    # so make it span >= 2 tiles whenever T allows a clean split.
    if reduction == "mean" and block_t is None and T >= 256 and tt >= T:
        alt = _dividing_block(T, max(128, ((T // 2) // 128) * 128), 128)
        if alt is not None:
            tt = alt

    n_b = pl.cdiv(B, tb)
    n_t = pl.cdiv(T, tt)
    Bp, Tp = n_b * tb, n_t * tt

    if Bp != B or Tp != T:
        # Benign-padded tail tiles: mu=0, sigma=1, target=0 -> nll == 0, so
        # padded batch rows don't perturb the mean (we divide by the true B),
        # and padded time columns are finite and sliced off the output.
        mu = _pad2d(mu, Bp, Tp, 0.0)
        sig = _pad2d(sig, Bp, Tp, 1.0)
        tgt = _pad2d(tgt, Bp, Tp, 0.0)

    if reduction == "mean":
        acc_rows = 8 if tb % 8 == 0 else tb
        in_specs = [pl.BlockSpec((tb, tt), lambda ti, bi: (bi, ti))
                    for _ in range(3)]
        out = pl.pallas_call(
            functools.partial(_gll_mean_kernel, inv_b=1.0 / B,
                              approx=approx_reciprocal),
            out_shape=jax.ShapeDtypeStruct((1, Tp), dtype),
            grid=(n_t, n_b),
            in_specs=in_specs,
            out_specs=pl.BlockSpec((1, tt), lambda ti, bi: (0, ti)),
            scratch_shapes=[pltpu.VMEM((acc_rows, tt), jnp.float32)],
            compiler_params=pltpu.CompilerParams(
                dimension_semantics=("parallel", "arbitrary"),
                vmem_limit_bytes=_VMEM_LIMIT_BYTES),
        )(mu, sig, tgt)
        return out[0, :T].reshape(T, 1)
    else:
        in_specs = [pl.BlockSpec((tb, tt), lambda bi, ti: (bi, ti))
                    for _ in range(3)]
        out = pl.pallas_call(
            functools.partial(_gll_none_kernel, approx=approx_reciprocal),
            out_shape=jax.ShapeDtypeStruct((Bp, Tp), dtype),
            grid=(n_b, n_t),
            in_specs=in_specs,
            out_specs=pl.BlockSpec((tb, tt), lambda bi, ti: (bi, ti)),
            compiler_params=pltpu.CompilerParams(
                dimension_semantics=("parallel", "parallel"),
                vmem_limit_bytes=_VMEM_LIMIT_BYTES),
        )(mu, sig, tgt)
        return out[:B, :T].reshape(B, T, 1)


def gaussian_log_likelihood(predictions, targets, reduction="mean", *,
                            block_b=None, block_t=None,
                            approx_reciprocal=False):
    """Module-compatible entry point.

    predictions: [B, T, 2]  (mu = [..., 0], sigma = [..., 1])
    targets:     [B, T, 1]
    Returns [T, 1] ('mean') or [B, T, 1] (otherwise).
    """
    B, T = predictions.shape[0], predictions.shape[1]
    # TODO(synk): the mu/sigma split below is one extra XLA HBM pass over
    # predictions; an in-kernel even/odd lane de-interleave needs lane-stride
    # compaction Mosaic can't do cheaply, so use the planar entry point to avoid it.
    mu = predictions[..., 0]         # [B, T]
    sig = predictions[..., 1]        # [B, T]
    tgt = targets.reshape(B, T)      # free reshape (drops trailing unit dim)
    return gaussian_log_likelihood_planar(
        mu, sig, tgt, reduction,
        block_b=block_b, block_t=block_t, approx_reciprocal=approx_reciprocal)


def _reference(predictions, targets, reduction="mean"):
    """Pure-JAX reference mirroring the PyTorch module."""
    mu = predictions[..., 0:1]
    sig = predictions[..., 1:2]
    var = sig ** 2
    loss = -(targets - mu) ** 2 / (2 * var) - jnp.log(sig)
    if reduction == "mean":
        loss = loss.mean(0)
    return -loss


if __name__ == "__main__":
    key = jax.random.PRNGKey(0)
    k_mu, k_sig, k_tgt = jax.random.split(key, 3)

    # --- Case 1: small, lane-dense, divisible shapes ---------------------------
    B, T = 16, 256
    mu = jax.random.normal(k_mu, (B, T, 1), dtype=jnp.float32)
    sig = jax.random.uniform(k_sig, (B, T, 1), dtype=jnp.float32,
                             minval=0.5, maxval=1.5)   # sigma > 0 for log()
    predictions = jnp.concatenate([mu, sig], axis=-1)  # [B, T, 2]
    targets = jax.random.normal(k_tgt, (B, T, 1), dtype=jnp.float32)

    ref_mean = _reference(predictions, targets, "mean")
    ref_none = _reference(predictions, targets, "none")

    # Default blocks (heuristic splits T into 2 parallel tiles for the mean path).
    out_mean = jax.block_until_ready(
        gaussian_log_likelihood(predictions, targets, "mean"))
    out_none = jax.block_until_ready(
        gaussian_log_likelihood(predictions, targets, "none"))

    # Explicit small blocks -> 2x2 grid: exercises pipelining + batch accumulator.
    out_mean_t = jax.block_until_ready(
        gaussian_log_likelihood(predictions, targets, "mean",
                                block_b=8, block_t=128))
    out_none_t = jax.block_until_ready(
        gaussian_log_likelihood(predictions, targets, "none",
                                block_b=8, block_t=128))

    assert out_mean.shape == ref_mean.shape == (T, 1)
    assert out_none.shape == ref_none.shape == (B, T, 1)
    assert out_mean_t.shape == (T, 1) and out_none_t.shape == (B, T, 1)
    assert jnp.allclose(out_mean, ref_mean, rtol=1e-5, atol=1e-5)
    assert jnp.allclose(out_none, ref_none, rtol=1e-5, atol=1e-5)
    assert jnp.allclose(out_mean_t, ref_mean, rtol=1e-5, atol=1e-5)
    assert jnp.allclose(out_none_t, ref_none, rtol=1e-5, atol=1e-5)

    # --- Case 2: ragged shape -> cdiv grid + benign-padded tail tiles ----------
    B2, T2 = 10, 200
    mu2 = jax.random.normal(k_mu, (B2, T2, 1), dtype=jnp.float32)
    sig2 = jax.random.uniform(k_sig, (B2, T2, 1), dtype=jnp.float32,
                              minval=0.5, maxval=1.5)
    pred2 = jnp.concatenate([mu2, sig2], axis=-1)
    tgt2 = jax.random.normal(k_tgt, (B2, T2, 1), dtype=jnp.float32)

    ref2_mean = _reference(pred2, tgt2, "mean")
    ref2_none = _reference(pred2, tgt2, "none")
    out2_mean = jax.block_until_ready(
        gaussian_log_likelihood(pred2, tgt2, "mean", block_b=8, block_t=128))
    out2_none = jax.block_until_ready(
        gaussian_log_likelihood(pred2, tgt2, "none", block_b=8, block_t=128))

    assert out2_mean.shape == ref2_mean.shape == (T2, 1)
    assert out2_none.shape == ref2_none.shape == (B2, T2, 1)
    assert jnp.allclose(out2_mean, ref2_mean, rtol=1e-5, atol=1e-5)
    assert jnp.allclose(out2_none, ref2_none, rtol=1e-5, atol=1e-5)

    print("KERNEL_OK")
</pallas_src>

<mosaic_0001>
module attributes {stable_mosaic.version = 11 : i64} {
  func.func @_gll_mean_kernel(%arg0: i32, %arg1: i32, %arg2: memref<16x128xf32, #tpu.memory_space<vmem>>, %arg3: memref<16x128xf32, #tpu.memory_space<vmem>>, %arg4: memref<16x128xf32, #tpu.memory_space<vmem>>, %arg5: memref<1x128xf32, #tpu.memory_space<vmem>>, %arg6: memref<8x128xf32, #tpu.memory_space<vmem>>) attributes {dimension_semantics = [#tpu.dimension_semantics<parallel>, #tpu.dimension_semantics<arbitrary>], iteration_bounds = array<i64: 2, 1>, scalar_prefetch = 0 : i64, scratch_operands = 1 : i64, tpu.core_type = #tpu.core_type<tc>, window_params = [{transform_indices = @transform_0, window_bounds = array<i64: 16, 128>}, {transform_indices = @transform_1, window_bounds = array<i64: 16, 128>}, {transform_indices = @transform_2, window_bounds = array<i64: 16, 128>}, {transform_indices = @transform_3, window_bounds = array<i64: 1, 128>}]} {
    %c0_i32 = arith.constant 0 : i32
    %0 = arith.cmpi eq, %arg1, %c0_i32 : i32
    %1 = arith.extui %0 : i1 to i32
    %c0_i32_0 = arith.constant 0 : i32
    %2 = arith.cmpi ne, %1, %c0_i32_0 : i32
    scf.if %2 {
      %cst_12 = arith.constant 0.000000e+00 : f32
      %24 = vector.broadcast %cst_12 : f32 to vector<8x128xf32>
      %c0_13 = arith.constant 0 : index
      %c0_14 = arith.constant 0 : index
      %25 = vector.load %arg6[%c0_13, %c0_14] : memref<8x128xf32, #tpu.memory_space<vmem>>, vector<8x128xf32>
      tpu.vector_store %arg6[%c0_13, %c0_14], %24 {strides = array<i32>} : memref<8x128xf32, #tpu.memory_space<vmem>>, vector<8x128xf32>,
    } else {
    }
    %c0 = arith.constant 0 : index
    %c0_1 = arith.constant 0 : index
    %3 = vector.load %arg2[%c0, %c0_1] : memref<16x128xf32, #tpu.memory_space<vmem>>, vector<16x128xf32>
    %c0_2 = arith.constant 0 : index
    %c0_3 = arith.constant 0 : index
    %4 = vector.load %arg3[%c0_2, %c0_3] : memref<16x128xf32, #tpu.memory_space<vmem>>, vector<16x128xf32>
    %c0_4 = arith.constant 0 : index
    %c0_5 = arith.constant 0 : index
    %5 = vector.load %arg4[%c0_4, %c0_5] : memref<16x128xf32, #tpu.memory_space<vmem>>, vector<16x128xf32>
    %6 = arith.subf %5, %3 : vector<16x128xf32>
    %7 = arith.mulf %4, %4 : vector<16x128xf32>
    %8 = arith.mulf %6, %6 : vector<16x128xf32>
    %cst = arith.constant 5.000000e-01 : f32
    %9 = vector.broadcast %cst : f32 to vector<16x128xf32>
    %10 = arith.mulf %9, %8 : vector<16x128xf32>
    %11 = tpu.reciprocal %7 : vector<16x128xf32> -> vector<16x128xf32>
    %12 = arith.mulf %10, %11 : vector<16x128xf32>
    %13 = math.log %4 : vector<16x128xf32>
    %14 = arith.addf %12, %13 : vector<16x128xf32>
    %15 = vector.extract_strided_slice %14 {offsets = [0, 0], sizes = [8, 128], strides = [1, 1]} : vector<16x128xf32> to vector<8x128xf32>
    %16 = vector.extract_strided_slice %14 {offsets = [8, 0], sizes = [8, 128], strides = [1, 1]} : vector<16x128xf32> to vector<8x128xf32>
    %17 = arith.addf %15, %16 : vector<8x128xf32>
    %c0_6 = arith.constant 0 : index
    %c0_7 = arith.constant 0 : index
    %18 = vector.load %arg6[%c0_6, %c0_7] : memref<8x128xf32, #tpu.memory_space<vmem>>, vector<8x128xf32>
    %19 = arith.addf %18, %17 : vector<8x128xf32>
    %c0_8 = arith.constant 0 : index
    %c0_9 = arith.constant 0 : index
    %20 = vector.load %arg6[%c0_8, %c0_9] : memref<8x128xf32, #tpu.memory_space<vmem>>, vector<8x128xf32>
    tpu.vector_store %arg6[%c0_8, %c0_9], %19 {strides = array<i32>} : memref<8x128xf32, #tpu.memory_space<vmem>>, vector<8x128xf32>,
    %c0_i32_10 = arith.constant 0 : i32
    %21 = arith.cmpi eq, %arg1, %c0_i32_10 : i32
    %22 = arith.extui %21 : i1 to i32
    %c0_i32_11 = arith.constant 0 : i32
    %23 = arith.cmpi ne, %22, %c0_i32_11 : i32
    scf.if %23 {
      %c0_12 = arith.constant 0 : index
      %c0_13 = arith.constant 0 : index
      %24 = vector.load %arg6[%c0_12, %c0_13] : memref<8x128xf32, #tpu.memory_space<vmem>>, vector<8x128xf32>
      %cst_14 = arith.constant dense<0.000000e+00> : vector<128xf32>
      %25 = vector.multi_reduction <add>, %24, %cst_14 [0] : vector<8x128xf32> to vector<128xf32>
      %26 = vector.shape_cast %25 : vector<128xf32> to vector<1x128xf32>
      %cst_15 = arith.constant 6.250000e-02 : f32
      %27 = vector.broadcast %cst_15 : f32 to vector<1x128xf32>
      %28 = arith.mulf %26, %27 : vector<1x128xf32>
      %c0_16 = arith.constant 0 : index
      %c0_17 = arith.constant 0 : index
      %29 = vector.load %arg5[%c0_16, %c0_17] : memref<1x128xf32, #tpu.memory_space<vmem>>, vector<1x128xf32>
      tpu.vector_store %arg5[%c0_16, %c0_17], %28 {strides = array<i32>} : memref<1x128xf32, #tpu.memory_space<vmem>>, vector<1x128xf32>,
    } else {
    }
    return
  }
  func.func @transform_0(%arg0: i32, %arg1: i32) -> (i32, i32) {
    %c0_i32 = arith.constant 0 : i32
    return %arg1, %arg0 : i32, i32
  }
  func.func @transform_1(%arg0: i32, %arg1: i32) -> (i32, i32) {
    %c0_i32 = arith.constant 0 : i32
    return %arg1, %arg0 : i32, i32
  }
  func.func @transform_2(%arg0: i32, %arg1: i32) -> (i32, i32) {
    %c0_i32 = arith.constant 0 : i32
    return %arg1, %arg0 : i32, i32
  }
  func.func @transform_3(%arg0: i32, %arg1: i32) -> (i32, i32) {
    %c0_i32 = arith.constant 0 : i32
    %c0_i32_0 = arith.constant 0 : i32
    return %c0_i32, %arg0 : i32, i32
  }
}

</mosaic_0001>

<bundles_post_ra>
// kernel: tpu_custom_call.1
= control target key start
LH: loop header
LB: loop body
LE: loop exit
PB: predicated region body
PF: predicated region fallthrough
CT: control target
= control target key end

     0   :  { %s965_s0 = inlined_call_operand.hbm [shape: f32[16,256], index: 0, kind: input, shape index: {}]   ;;  %s966_s1 = inlined_call_operand.hbm [shape: f32[16,256], index: 1, kind: input, shape index: {}]   ;;  %s967_s2 = inlined_call_operand.hbm [shape: f32[16,256], index: 2, kind: input, shape index: {}]   ;;  %s968_s3 = inlined_call_operand.hbm [shape: f32[1,256], index: 3, kind: output, shape index: {}]  }
   0x1   :  { %974 = sst [smem:[#allocation16_spill]] %s965_s0 }
   0x2   :  { %975 = sst [smem:[#allocation17_spill]] %s966_s1 }
   0x3   :  { %8 = vsyncpa [#allocation4], 0 }
   0x4   :  { %10 = vsyncpa [#allocation4 + $0x1], 0 }
   0x5   :  { %11 = vsyncpa [#allocation7], 0 }
   0x6   :  { %13 = vsyncpa [#allocation7 + $0x1], 0 }
   0x7   :  { %14 = vsyncpa [#allocation5], 0 }
   0x8   :  { %16 = vsyncpa [#allocation5 + $0x1], 0  ;;  %s770_s12 = smov 0   ;;  %s772_s13 = smov 0  }
   0x9   :  { %s774_s14 = smov 0   ;;  %s776_s15 = smov 0  }
   0xa   :  { %s778_s16 = smov 0   ;;  %s780_s17 = smov 0  }
   0xb LB: > { %976 = sst [smem:[#allocation13_spill]] %s737_s16  ;;  %s801_s18 = sadd.s32 4294967295, %s741_s17   ;;  %s741_s17 = sphi %s780_s17, %s22_s17   ;;  %s737_s16 = sphi %s778_s16, %s992_s16   ;;  %s733_s15 = sphi %s776_s15, %s991_s15   ;;  %s729_s14 = sphi %s774_s14, %s995_s14   ;;  %s725_s13 = sphi %s772_s13, %s994_s13   ;;  %s721_s12 = sphi %s770_s12, %s993_s12  }
   0xc   : > { %s474_s19 = sadd.s32 4294967294, %s741_s17   ;;  %s34_s20 = sadd.s32 1, %s737_s16 }
   0xd   : > { %s43_s21 = sadd.s32 1, %s729_s14  ;;  %p36_p0 = scmp.ge.s32.totalorder %s34_s20, 2 }
   0xe   : > { %p50_p1 = scmp.ne.s32.totalorder %s729_s14, %s725_s13  ;;  %p51_p2 = scmp.eq.s32.totalorder %s741_s17, 0 }
   0xf   : > { %p56_p3 = scmp.ne.s32.totalorder %s725_s13, %s721_s12  ;;  %s997_s20 = smov (%p36_p0, %s34_s20), 0 }
  0x10   : > { %977 = sst [smem:[#allocation14_spill]] %s997_s20  ;;  %p813_p4 = por %p51_p2, %p50_p1 }
  0x11   : > { %p57_p5 = scmp.eq.s32.totalorder %s801_s18, 0  ;;  %s39_s23 = ssub.s32 %s737_s16, %s997_s20 }
  0x12   : > { %p136_p6 = scmp.eq.s32.totalorder %s801_s18, 1  ;;  %p41_p7 = scmp.eq.s32.totalorder %s39_s23, 0 }
  0x13   : > { %p821_p8 = por %p57_p5, %p56_p3  ;;  %p142_p10 = scmp.eq.s32.totalorder %s474_s19, 1 }
  0x14   : > { %p825_p9 = por %p136_p6, %p50_p1  ;;  %p512_p13 = scmp.lt.s32.totalorder %s741_s17, 2 }
  0x15   : > { %s830_s26 = scalar_select %p41_p7, %s729_s14, %s43_s21  }
  0x16   : > { %p832_p11 = por %p142_p10, %p56_p3  ;;  %s969_s28 = sand.u32 1, %s729_s14  }
  0x17   : > { %981 = sst [smem:[#allocation15_spill]] %s830_s26  ;;  %s841_s29 = sshll.u32 %s969_s28, 4 }
  0x18   : > { %s844_s30 = sshll.u32 %s737_s16, 7  ;;  %p848_p0 = pnand %p512_p13, %p813_p4 }
  0x19   : > { %s185_s5 = sand.u32 1, %s741_s17   ;;  %s984_s1 = sld [smem:[#allocation17_spill]] }
  0x1a   : > { %s189_s9 = scalar_lea.vmem [#allocation6], %s841_s29  ;;  %p483_p1 = scmp.ge.s32.totalorder %s741_s17, 1 }
  0x1b   : > { %s198_s10 = sshll.u32 %s189_s9, 4  ;;  %s859_s11 = scalar_lea.sflag [#allocation7], %s185_s5  ;;  %s199_s10 = int_to_ptr.vmem [resolvable:$true] %s198_s10 }
  0x1c   : > { %p575_p2 = pneg %p848_p0  ;;  %s586_s19 = scalar_lea.vmem %s199_s10, 256 }
  0x1d   : > { %p587_p3 = scmp.ne.s32.totalorder %s199_s10, %s586_s19  ;;  %s743_s21 = smov [#allocation6]  }
  0x1e   : > { %s591_s22 = sshll.u32 %s743_s21, 4  ;;  %s592_s22 = int_to_ptr.vmem [resolvable:$false] %s591_s22 }
  0x1f   : > { %s197_s8 = scalar_lea.hbm %s984_s1, %s844_s30  ;;  %p589_p4 = pnand %p587_p3, %p575_p2 }
  0x20   : > { %s593_s23 = scalar_lea.vmem %s592_s22, 512  ;;  %p594_p6 = scmp.lt.s32.totalorder %s199_s10, %s592_s22 }
  0x21   : > { %p590_p5 = pneg %p589_p4  ;;  %p595_p7 = scmp.lt.s32.totalorder %s593_s23, %s586_s19 }
  0x23   : > { %p596_p10 = por %p595_p7, %p594_p6 }
  0x25   : > { %p597_p13 = pnand %p596_p10, %p590_p5 }
  0x27   : > { %600 = shalt.err (!%p597_p13)
}
  0x28   : > { %s972_s6 = smov 256   ;;  %s745_s5 = smov 128  }
  0x29   : > { %s746_s7 = smov 8   ;;  %p229_p3 = scmp.lt.s32.totalorder %s741_s17, 3 }
  0x2a   : > { %504 = dma.hbm_to_vmem [thread:$0]  (!%p848_p0), %s197_s8, 256, %s199_s10, %s859_s11, %s972_s6, %s745_s5, %s746_s7  }
  0x2b   : > { %p875_p4 = pnand %p483_p1, %p229_p3  ;;  %s986_s0 = sld [smem:[#allocation16_spill]] }
  0x2c   : > { %s166_s23 = scalar_lea.vmem [#allocation3], %s841_s29  ;;  %s987_s1 = sand.u32 1, %s729_s14  }
  0x2d   : > { %s175_s28 = sshll.u32 %s166_s23, 4  ;;  %s163_s20 = scalar_lea.sflag [#allocation4], %s987_s1  ;;  %s176_s28 = int_to_ptr.vmem [resolvable:$true] %s175_s28 }
  0x2e   : > { %s614_s16 = scalar_lea.vmem %s176_s28, 256  ;;  %s747_s8 = smov [#allocation3]  }
  0x2f   : > { %p615_p5 = scmp.ne.s32.totalorder %s176_s28, %s614_s16  ;;  %s619_s10 = sshll.u32 %s747_s8, 4  ;;  %s620_s10 = int_to_ptr.vmem [resolvable:$false] %s619_s10 }
  0x30   : > { %s621_s6 = scalar_lea.vmem %s620_s10, 512  ;;  %p622_p1 = scmp.lt.s32.totalorder %s176_s28, %s620_s10 }
  0x31   : > { %s174_s22 = scalar_lea.hbm %s986_s0, %s844_s30  ;;  %p617_p6 = pnand %p615_p5, %p575_p2 }
  0x32   : > { %p623_p10 = scmp.lt.s32.totalorder %s621_s6, %s614_s16 }
  0x33   : > { %p618_p7 = pneg %p617_p6 }
  0x34   : > { %p624_p13 = por %p623_p10, %p622_p1 }
  0x36   : > { %p625_p3 = pnand %p624_p13, %p618_p7 }
  0x38   : > { %628 = shalt.err (!%p625_p3)
}
  0x39   : > { %s988_s1 = smov 256   ;;  %s220_s23 = scalar_lea.hbm %s967_s2, %s844_s30 }
  0x3a   : > { %501 = dma.hbm_to_vmem [thread:$0]  (!%p848_p0), %s174_s22, 256, %s176_s28, %s163_s20, %s988_s1, %s745_s5, %s746_s7  }
  0x3b   : > { %s212_s8 = scalar_lea.vmem [#allocation8], %s841_s29  ;;  %s748_s6 = smov [#allocation8]  }
  0x3c   : > { %s221_s0 = sshll.u32 %s212_s8, 4  ;;  %s647_s10 = sshll.u32 %s748_s6, 4  ;;  %s222_s0 = int_to_ptr.vmem [resolvable:$true] %s221_s0  ;;  %s648_s10 = int_to_ptr.vmem [resolvable:$false] %s647_s10 }
  0x3d   : > { %s642_s16 = scalar_lea.vmem %s222_s0, 256  ;;  %s649_s26 = scalar_lea.vmem %s648_s10, 512 }
  0x3e   : > { %p643_p5 = scmp.ne.s32.totalorder %s222_s0, %s642_s16  ;;  %p650_p1 = scmp.lt.s32.totalorder %s222_s0, %s648_s10 }
  0x3f   : > { %p651_p10 = scmp.lt.s32.totalorder %s649_s26, %s642_s16 }
  0x40   : > { %p645_p6 = pnand %p643_p5, %p575_p2 }
  0x41   : > { %p652_p13 = por %p651_p10, %p650_p1 }
  0x42   : > { %p646_p7 = pneg %p645_p6 }
  0x44   : > { %p653_p3 = pnand %p652_p13, %p646_p7 }
  0x46   : > { %656 = shalt.err (!%p653_p3)
}
  0x47   : > { %507 = dma.hbm_to_vmem [thread:$0]  (!%p848_p0), %s220_s23, 256, %s222_s0, %s859_s11, %s988_s1, %s745_s5, %s746_s7  }
  0x48   : > { %233 = sbr.rel (%p875_p4) target bundleno = 132 (0x84), region = 32  ;;  %s911_s20 = sand.u32 (!%p875_p4), 1, %s725_s13  }
  0x49   : > { %s484_s26 = sshll.u32 (!%p875_p4), %s911_s20, 4  ;;  %s236_s28 = scalar_lea.sflag (!%p875_p4), [#allocation4], %s911_s20 }
  0x4a   : > { %s239_s29 = scalar_lea.vmem (!%p875_p4), [#allocation3], %s484_s26 }
  0x4d   : > { %708 = dma.done.wait (%p821_p8), %s236_s28, 256  }
  0x4e   : > { %710 = vsyncadd (%p821_p8), %s236_s28, 4294967040  ;;  %s244_s0 = sand.u32 1, %s801_s18   ;;  %s248_s4 = scalar_lea.vmem [#allocation6], %s484_s26 }
  0x4f   : > { %s245_s30 = scalar_lea.sflag [#allocation7], %s244_s0 }
  0x50   : > { %712 = dma.done.wait (%p821_p8), %s245_s30, 512  }
  0x51   : > { %714 = vsyncadd (%p821_p8), %s245_s30, 4294966784  ;;  %v299_v0 = vld [vmem:[%s248_s4] sm:$0xff]  ;;  %v300_v1 = vld [vmem:[%s248_s4 + $0x8] sm:$0xff]  ;;  %s257_s11 = scalar_lea.vmem [#allocation8], %s484_s26  ;;  %s288_s18 = scalar_lea.vmem [#allocation9], %s911_s20 }
  0x52   : > { %v305_v2 = vmul.f32 %v299_v0, %v299_v0  ;;  %565 = vlog2.f32 %v299_v0  ;;  %v297_v3 = vld [vmem:[%s239_s29] sm:$0xff]  ;;  %v306_v5 = vmul.f32 %v300_v1, %v300_v1  ;;  %v298_v6 = vld [vmem:[%s239_s29 + $0x8] sm:$0xff]  ;;  %s350_s24 = sshll.u32 %s288_s18, 4  ;;  %s487_s5 = sshll.u32 %s733_s15, 4  ;;  %s351_s24 = int_to_ptr.vmem [resolvable:$true] %s350_s24 }
  0x53   : > { %v301_v4 = vld [vmem:[%s257_s11] sm:$0xff]  ;;  %567 = vlog2.f32 %v300_v1  ;;  %v302_v7 = vld [vmem:[%s257_s11 + $0x8] sm:$0xff]  ;;  %s348_s22 = scalar_lea.hbm %s968_s3, %s487_s5  ;;  %s338_s1 = scalar_lea.sflag [#allocation5], %s911_s20 }
  0x54   : > { %569 = vrcp.f32 %v305_v2  ;;  %v303_v8 = vsub.f32 %v301_v4, %v297_v3  ;;  %v304_v9 = vsub.f32 %v302_v7, %v298_v6  ;;  %s657_s19 = scalar_lea.vmem %s351_s24, 16  ;;  %s749_s21 = smov [#allocation9]  }
  0x55   : > { %571 = vrcp.f32 %v306_v5  ;;  %p658_p8 = scmp.ne.s32.totalorder %s351_s24, %s657_s19  ;;  %s661_s23 = sshll.u32 %s749_s21, 4  ;;  %s662_s23 = int_to_ptr.vmem [resolvable:$false] %s661_s23 }
  0x56   : > { %v307_v10 = vmul.f32 %v303_v8, %v303_v8  ;;  %v308_v11 = vmul.f32 %v304_v9, %v304_v9  ;;  %s663_s8 = scalar_lea.vmem %s662_s23, 32  ;;  %p664_p4 = scmp.lt.s32.totalorder %s351_s24, %s662_s23 }
  0x57   : > { %p659_p0 = pnand %p658_p8, %p825_p9  ;;  %p665_p5 = scmp.lt.s32.totalorder %s663_s8, %s657_s19 }
  0x58   : > { %v309_v12 = vmul.f32 0.5, %v307_v10  ;;  %v310_v14 = vmul.f32 0.5, %v308_v11 }
  0x59   : > { %p660_p2 = pneg %p659_p0  ;;  %p666_p6 = por %p665_p5, %p664_p4 }
  0x5b   : > { %p667_p7 = pnand %p666_p6, %p660_p2 }
  0x5f   : > { %v566_v13 = vpop.eup %565 }
  0x60   : > { %v568_v15 = vpop.eup %567  ;;  %v316_v16 = vmul.f32 0.6931472, %v566_v13 }
  0x61   : > { %v570_v17 = vpop.eup %569  ;;  %v318_v18 = vmul.f32 0.6931472, %v568_v15 }
  0x62   : > { %v572_v19 = vpop.eup %571  ;;  %v313_v20 = vmul.f32 %v570_v17, %v309_v12 }
  0x63   : > { %v314_v21 = vmul.f32 %v572_v19, %v310_v14 }
  0x64   : > { %v319_v22 = vadd.f32 %v316_v16, %v313_v20 }
  0x65   : > { %v320_v23 = vadd.f32 %v318_v18, %v314_v21 }
  0x67   : > { %v321_v24 = vadd.f32 %v320_v23, %v319_v22 }
  0x69   : > { %v329_v25 = vrot.slane %v321_v24, 4 }
  0x6b   : > { %v330_v26 = vadd.f32 %v329_v25, %v321_v24 }
  0x6d   : > { %v331_v27 = vrot.slane %v330_v26, 2 }
  0x6f   : > { %v332_v28 = vadd.f32 %v331_v27, %v330_v26 }
  0x71   : > { %v333_v29 = vrot.slane %v332_v28, 1 }
  0x73   : > { %v334_v30 = vadd.f32 %v333_v29, %v332_v28 }
  0x75   : > { %v335_v31 = vmul.f32 0.0625, %v334_v30 }
  0x77   : > { %336 = vst [vmem:[%s288_s18] sm:$0x1] %v335_v31 }
  0x78   : > { %670 = shalt.err (!%p667_p7)
}
  0x79   : > { %s671_s15 = scalar_lea.hbm %s348_s22, 16  ;;  %s675_s10 = scalar_lea.hbm %s968_s3, 32 }
  0x7a   : > { %p672_p1 = scmp.ne.s32.totalorder %s348_s22, %s671_s15  ;;  %p676_p3 = scmp.lt.s32.totalorder %s348_s22, %s968_s3 }
  0x7b   : > { %p677_p8 = scmp.lt.s32.totalorder %s675_s10, %s671_s15 }
  0x7c   : > { %p673_p10 = pnand %p672_p1, %p825_p9 }
  0x7d   : > { %p678_p0 = por %p677_p8, %p676_p3 }
  0x7e   : > { %p674_p13 = pneg %p673_p10 }
  0x80   : > { %p679_p12 = pnand %p678_p0, %p674_p13 }
  0x82   : > { %682 = shalt.err (!%p679_p12)
}
  0x83   : > { %496 = dma.vmem_to_hbm [thread:$0]  (%p825_p9), %s351_s24, 16, %s348_s22, %s338_s1  }
  0x84 PF: > { %s362_s28 = sand.u32 1, %s721_s12   ;;  %p989_p2 = scmp.ge.s32.totalorder %s741_s17, 2 }
  0x85   : > { %s363_s29 = scalar_lea.sflag [#allocation5], %s362_s28 }
  0x86   : > { %p509_p4 = pnand %p989_p2, %p832_p11 }
  0x88   : > { %p510_p5 = pneg %p509_p4 }
  0x8a   : > { %716 = dma.done.wait (%p510_p5), %s363_s29, 16  }
  0x8b   : > { %718 = vsyncadd (%p510_p5), %s363_s29, 4294967280  ;;  %s22_s17 = sadd.s32 1, %s741_s17   ;;  %s990_s0 = sld [smem:[#allocation15_spill]] }
  0x8c   : > { %p19_p6 = scmp.ge.s32.totalorder %s22_s17, 4   ;;  %s991_s15 = sld [smem:[#allocation13_spill]] }
  0x8d   : > { %s992_s16 = sld [smem:[#allocation14_spill]]  ;;  %s993_s12 = smov %s725_s13 }
  0x8e   : > { %s994_s13 = smov %s729_s14  ;;  %21 = sbr.rel (!%p19_p6) target bundleno = 11 (0xb), region = 109 }
  0x91   : > { %s995_s14 = smov %s990_s0 }
  0x93   :  { %367 = vsyncpa [#allocation4], 1 }
  0x94   :  { %369 = vsyncpa [#allocation4 + $0x1], 1 }
  0x95   :  { %370 = vsyncpa [#allocation7], 1 }
  0x96   :  { %372 = vsyncpa [#allocation7 + $0x1], 1 }
  0x97   :  { %373 = vsyncpa [#allocation5], 1 }
  0x98   :  { %375 = vsyncpa [#allocation5 + $0x1], 1 }

</bundles_post_ra>
